<compile_context>
chip_gen: v7x
topology: tpu7x:2x2x1
jax: 0.10.0
libtpu: 0.0.40
codegen_flags: <defaults>
</compile_context>

<pallas_src>
import math

import numpy as np
import jax
import jax.numpy as jnp
from jax import lax
from jax.experimental import pallas as pl
from jax.experimental.pallas import tpu as pltpu


def _sublane_multiple(dtype) -> int:
    return {4: 8, 2: 16, 1: 32}.get(jnp.dtype(dtype).itemsize, 8)


def tv_loss(x, tvloss_weight=1.0, *, target_block_bytes=2 << 20):
    """TVLoss forward. x: [B, C, H, W] (float dtype). Returns f32 scalar."""
    B, C, H, W = x.shape
    N = B * C
    HW = H * W
    itemsize = jnp.dtype(x.dtype).itemsize

    # ---- lane-dense whole-image rows: Lw = m * H * W ------------------------
    m = 128 // math.gcd(HW, 128)          # smallest m with 128 | m*H*W
    if m * HW * itemsize > (1 << 20):     # keep one packed row <= ~1 MiB;
        m = 1                             # accept lane padding for big images
    Lw = m * HW

    x2 = x.reshape(N, HW)                 # free reshape (contiguous row-major)
    pad_n = (-N) % m
    if pad_n:                             # all-zero images contribute 0 to TV
        x2 = jnp.pad(x2, ((0, pad_n), (0, 0)))
    Rv = (N + pad_n) // m
    xv = x2.reshape(Rv, Lw)               # free reshape

    # TODO(synk): very large images (one packed row approaching the VMEM
    # budget) need H-tiling with a 1-row halo instead of whole-image rows.

    # ---- row-block size: ~target_block_bytes per step, (8,128)-legal --------
    sub = _sublane_multiple(x.dtype)
    row_bytes = Lw * itemsize
    tR = max(sub, (target_block_bytes // row_bytes) // sub * sub)
    tR = min(tR, Rv) if Rv >= sub else Rv          # tR==Rv (full dim) is legal
    if tR == Rv and Rv >= 2 * sub:
        # Give a megacore (v7x) at least 2 'parallel' grid steps.
        tR = ((Rv + 1) // 2 + sub - 1) // sub * sub
    G = pl.cdiv(Rv, tR)
    needs_row_mask = (G * tR != Rv)

    # ---- per-lane {0,1} masks removing seam / wrap-around pairs -------------
    idx = np.arange(Lw)
    w_keep = ((idx % W) != (W - 1)).astype(np.float32).reshape(1, Lw)
    h_keep = (((idx // W) % H) != (H - 1)).astype(np.float32).reshape(1, Lw)

    def kernel(x_ref, wk_ref, hk_ref, out_ref):
        xf = x_ref[...].astype(jnp.float32)
        if needs_row_mask:
            # Zero rows past Rv (partial last block reads unspecified data).
            row = lax.broadcasted_iota(jnp.int32, xf.shape, 0) + pl.program_id(0) * tR
            xf = jnp.where(row < Rv, xf, 0.0)

        def cyc_shift(v, dist):
            # v[:, (c + dist) % Lw]; pltpu.roll follows jnp.roll semantics.
            d = dist % Lw
            return v if d == 0 else pltpu.roll(v, shift=Lw - d, axis=1)

        # W direction: pairs (c, c+1); lanes with c % W == W-1 are seams.
        d1 = cyc_shift(xf, 1) - xf
        w_part = jnp.sum(d1 * d1 * wk_ref[...])

        # H direction: pairs (c, c+W); lanes in an image's last row are seams.
        dW = cyc_shift(xf, W) - xf
        h_part = jnp.sum(dW * dW * hk_ref[...])

        # One lane-dense (8,128) store per step: h in sublanes 0-3, w in 4-7.
        sublane = lax.broadcasted_iota(jnp.int32, (8, 128), 0)
        out_ref[...] = jnp.where(sublane < 4, h_part, w_part)

    cost = pl.CostEstimate(
        flops=8 * Rv * Lw,
        transcendentals=0,
        bytes_accessed=Rv * Lw * itemsize + 2 * Lw * 4 + G * 8 * 128 * 4,
    )

    parts = pl.pallas_call(
        kernel,
        out_shape=jax.ShapeDtypeStruct((G * 8, 128), jnp.float32),
        grid_spec=pltpu.PrefetchScalarGridSpec(
            num_scalar_prefetch=0,
            grid=(G,),
            in_specs=[
                pl.BlockSpec((tR, Lw), lambda g: (g, 0)),
                pl.BlockSpec((1, Lw), lambda g: (0, 0)),
                pl.BlockSpec((1, Lw), lambda g: (0, 0)),
            ],
            out_specs=pl.BlockSpec((8, 128), lambda g: (g, 0)),
        ),
        compiler_params=pltpu.CompilerParams(
            dimension_semantics=("parallel",),
            vmem_limit_bytes=48 * 1024 * 1024,
        ),
        cost_estimate=cost,
    )(xv, jnp.asarray(w_keep), jnp.asarray(h_keep))

    parts = parts.reshape(G, 8, 128)
    h_tv = jnp.sum(parts[:, 0, 0])
    w_tv = jnp.sum(parts[:, 4, 0])

    count_h = C * (H - 1) * W             # numel(x[:, :, 1:, :]) / B
    count_w = C * H * (W - 1)             # numel(x[:, :, :, 1:]) / B
    return tvloss_weight * 2.0 * (h_tv / count_h + w_tv / count_w) / B


def tv_loss_ref(x, tvloss_weight=1.0):
    """Pure-JAX reference mirroring the PyTorch forward exactly."""
    B, C, H, W = x.shape
    count_h = C * (H - 1) * W
    count_w = C * H * (W - 1)
    h_tv = jnp.sum(jnp.square(x[:, :, 1:, :] - x[:, :, : H - 1, :]))
    w_tv = jnp.sum(jnp.square(x[:, :, :, 1:] - x[:, :, :, : W - 1]))
    return tvloss_weight * 2.0 * (h_tv / count_h + w_tv / count_w) / B


if __name__ == "__main__":
    key = jax.random.PRNGKey(0)
    x = jax.random.normal(key, (2, 4, 16, 16), dtype=jnp.float32)

    out = jax.block_until_ready(tv_loss(x))
    ref = jax.block_until_ready(tv_loss_ref(x))

    assert jnp.allclose(out, ref, rtol=1e-5, atol=1e-5), (out, ref)
    print("KERNEL_OK")
</pallas_src>

<mosaic_0001>
module attributes {stable_mosaic.version = 11 : i64} {
  func.func @kernel(%arg0: i32, %arg1: memref<8x256xf32, #tpu.memory_space<vmem>>, %arg2: memref<1x256xf32, #tpu.memory_space<vmem>>, %arg3: memref<1x256xf32, #tpu.memory_space<vmem>>, %arg4: memref<8x128xf32, #tpu.memory_space<vmem>>) attributes {dimension_semantics = [#tpu.dimension_semantics<parallel>], iteration_bounds = array<i64: 1>, scalar_prefetch = 0 : i64, scratch_operands = 0 : i64, tpu.core_type = #tpu.core_type<tc>, window_params = [{transform_indices = @transform_0, window_bounds = array<i64: 8, 256>}, {pipeline_mode = #tpu.pipeline_mode<synchronous>, transform_indices = @transform_1, window_bounds = array<i64: 1, 256>}, {pipeline_mode = #tpu.pipeline_mode<synchronous>, transform_indices = @transform_2, window_bounds = array<i64: 1, 256>}, {transform_indices = @transform_3, window_bounds = array<i64: 8, 128>}]} {
    %c0 = arith.constant 0 : index
    %c0_0 = arith.constant 0 : index
    %0 = vector.load %arg1[%c0, %c0_0] : memref<8x256xf32, #tpu.memory_space<vmem>>, vector<8x256xf32>
    %c255_i32 = arith.constant 255 : i32
    %1 = tpu.dynamic_rotate %0 by %c255_i32 dim 1 : vector<8x256xf32>, i32 -> vector<8x256xf32>
    %2 = arith.subf %1, %0 : vector<8x256xf32>
    %3 = arith.mulf %2, %2 : vector<8x256xf32>
    %c0_1 = arith.constant 0 : index
    %c0_2 = arith.constant 0 : index
    %4 = vector.load %arg2[%c0_1, %c0_2] : memref<1x256xf32, #tpu.memory_space<vmem>>, vector<1x256xf32>
    %5 = vector.broadcast %4 : vector<1x256xf32> to vector<8x256xf32>
    %6 = arith.mulf %3, %5 : vector<8x256xf32>
    %7 = vector.shape_cast %6 : vector<8x256xf32> to vector<1x8x256xf32>
    %cst = arith.constant dense<0.000000e+00> : vector<1xf32>
    %8 = vector.multi_reduction <add>, %7, %cst [1, 2] : vector<1x8x256xf32> to vector<1xf32>
    %9 = vector.shape_cast %8 : vector<1xf32> to vector<1x1x1xf32>
    %10 = vector.extract %9[0, 0, 0] : f32 from vector<1x1x1xf32>
    %c240_i32 = arith.constant 240 : i32
    %11 = tpu.dynamic_rotate %0 by %c240_i32 dim 1 : vector<8x256xf32>, i32 -> vector<8x256xf32>
    %12 = arith.subf %11, %0 : vector<8x256xf32>
    %13 = arith.mulf %12, %12 : vector<8x256xf32>
    %c0_3 = arith.constant 0 : index
    %c0_4 = arith.constant 0 : index
    %14 = vector.load %arg3[%c0_3, %c0_4] : memref<1x256xf32, #tpu.memory_space<vmem>>, vector<1x256xf32>
    %15 = vector.broadcast %14 : vector<1x256xf32> to vector<8x256xf32>
    %16 = arith.mulf %13, %15 : vector<8x256xf32>
    %17 = vector.shape_cast %16 : vector<8x256xf32> to vector<1x8x256xf32>
    %cst_5 = arith.constant dense<0.000000e+00> : vector<1xf32>
    %18 = vector.multi_reduction <add>, %17, %cst_5 [1, 2] : vector<1x8x256xf32> to vector<1xf32>
    %19 = vector.shape_cast %18 : vector<1xf32> to vector<1x1x1xf32>
    %20 = vector.extract %19[0, 0, 0] : f32 from vector<1x1x1xf32>
    %21 = tpu.iota {dimensions = array<i32: 0>} : vector<8x128xi32>
    %c4_i32 = arith.constant 4 : i32
    %22 = vector.broadcast %c4_i32 : i32 to vector<8x128xi32>
    %23 = arith.cmpi slt, %21, %22 : vector<8x128xi32>
    %24 = vector.broadcast %20 : f32 to vector<8x128xf32>
    %25 = vector.broadcast %10 : f32 to vector<8x128xf32>
    %26 = arith.select %23, %24, %25 : vector<8x128xi1>, vector<8x128xf32>
    %c0_6 = arith.constant 0 : index
    %c0_7 = arith.constant 0 : index
    %27 = vector.load %arg4[%c0_6, %c0_7] : memref<8x128xf32, #tpu.memory_space<vmem>>, vector<8x128xf32>
    tpu.vector_store %arg4[%c0_6, %c0_7], %26 {strides = array<i32>} : memref<8x128xf32, #tpu.memory_space<vmem>>, vector<8x128xf32>,
    return
  }
  func.func @transform_0(%arg0: i32) -> (i32, i32) {
    %c0_i32 = arith.constant 0 : i32
    %c0_i32_0 = arith.constant 0 : i32
    return %arg0, %c0_i32 : i32, i32
  }
  func.func @transform_1(%arg0: i32) -> (i32, i32) {
    %c0_i32 = arith.constant 0 : i32
    %c0_i32_0 = arith.constant 0 : i32
    %c0_i32_1 = arith.constant 0 : i32
    return %c0_i32, %c0_i32_0 : i32, i32
  }
  func.func @transform_2(%arg0: i32) -> (i32, i32) {
    %c0_i32 = arith.constant 0 : i32
    %c0_i32_0 = arith.constant 0 : i32
    %c0_i32_1 = arith.constant 0 : i32
    return %c0_i32, %c0_i32_0 : i32, i32
  }
  func.func @transform_3(%arg0: i32) -> (i32, i32) {
    %c0_i32 = arith.constant 0 : i32
    %c0_i32_0 = arith.constant 0 : i32
    return %arg0, %c0_i32 : i32, i32
  }
}

</mosaic_0001>

<bundles_post_ra>
// kernel: tpu_custom_call.1
= control target key start
LH: loop header
LB: loop body
LE: loop exit
PB: predicated region body
PF: predicated region fallthrough
CT: control target
= control target key end

     0   :  { %8 = vsyncpa [#allocation3], 0  ;;  %s233_s0 = inlined_call_operand.hbm [shape: f32[8,256], index: 0, kind: input, shape index: {}]   ;;  %s234_s1 = inlined_call_operand.vmem [shape: f32[1,256], index: 1, kind: input, shape index: {}]   ;;  %s235_s2 = inlined_call_operand.vmem [shape: f32[1,256], index: 2, kind: input, shape index: {}]   ;;  %s236_s3 = inlined_call_operand.hbm [shape: f32[8,128], index: 3, kind: output, shape index: {}]  }
   0x1   :  { %9 = vsyncpa [#allocation4], 0  ;;  %s179_s12 = smov [#allocation2]   ;;  %s131_s16 = scalar_lea.hbm %s233_s0, 256 }
   0x2   :  { %s16_s13 = sshll.u32 %s179_s12, 4  ;;  %p132_p0 = scmp.ne.s32.totalorder %s233_s0, %s131_s16  ;;  %s17_s13 = int_to_ptr.vmem [resolvable:$true] %s16_s13 }
   0x3   :  { %p135_p1 = scmp.lt.u32.totalorder %s131_s16, %s233_s0 }
   0x5   :  { %p137_p2 = pnand %p135_p1, %p132_p0 }
   0x7   :  { %140 = shalt.err (!%p137_p2)
}
   0x8   :  { %s141_s21 = scalar_lea.vmem %s17_s13, 256  ;;  %p146_p4 = scmp.lt.s32.totalorder %s17_s13, %s17_s13 }
   0x9   :  { %p142_p3 = scmp.ne.s32.totalorder %s17_s13, %s141_s21  ;;  %p147_p5 = scmp.lt.s32.totalorder %s141_s21, %s141_s21 }
   0xb   :  { %p148_p6 = por %p147_p5, %p146_p4 }
   0xd   :  { %p149_p7 = pnand %p148_p6, %p142_p3 }
   0xf   :  { %152 = shalt.err (!%p149_p7)
}
  0x10   :  { %19 = dma.hbm_to_vmem [thread:$0]  %s233_s0, 256, %s17_s13, [#allocation3]  }
  0x11   :  { %175 = dma.done.wait [#allocation3], 256  }
  0x12   :  { %176 = vsyncadd [#allocation3], 4294967040  ;;  %v27_v0 = vld [vmem:[#allocation2] sm:$0xff]  ;;  %s180_s24 = smov 112   ;;  %s181_s25 = smov 127   ;;  %v28_v1 = vld [vmem:[#allocation2 + $0x8] sm:$0xff]  ;;  %v33_v2 = vlaneseq }
  0x13   :  { %66 = vrot.lane.b32.xlu1 %v27_v0, %s180_s24  ;;  %29 = vrot.lane.b32.xlu0 %v27_v0, %s181_s25  ;;  %v77_v9 = vld [vmem:[%s235_s2] sm:$0x3] }
  0x14   :  { %v45_v3 = vshrl.u32 %v33_v2, 7  ;;  %v34_v4 = vand.u32 127, %v33_v2  ;;  %v42_v10 = vld [vmem:[%s234_s1] sm:$0x3]  ;;  %s182_s1 = smov [#allocation5]  }
  0x15   :  { %s114_s2 = sshll.u32 %s182_s1, 4  ;;  %s115_s2 = int_to_ptr.vmem [resolvable:$true] %s114_s2 }
  0x16   :  { %v46_v7 = vsub.s32 0, %v45_v3  ;;  %v50_v8 = vsub.s32 1, %v45_v3  ;;  %vm70_vm0 = vcmp.lt.s32.totalorder %v34_v4, 112  ;;  %vm35_vm1 = vcmp.lt.s32.totalorder %v34_v4, 127  ;;  %s153_s4 = scalar_lea.vmem %s115_s2, 128  ;;  %p158_p9 = scmp.lt.s32.totalorder %s115_s2, %s115_s2 }
  0x17   :  { %68 = vrot.lane.b32.xlu1 %v28_v1, %s180_s24  ;;  %31 = vrot.lane.b32.xlu0 %v28_v1, %s181_s25  ;;  %vm103_vm2 = vcmp.lt.s32.totalorder %v45_v3, 4  ;;  %p154_p8 = scmp.ne.s32.totalorder %s115_s2, %s153_s4  ;;  %p159_p10 = scmp.lt.s32.totalorder %s153_s4, %s153_s4 }
  0x18   :  { %v82_v13 = vrot.slane %v77_v9, %v46_v7  ;;  %v86_v14 = vrot.slane %v77_v9, %v50_v8  ;;  %v47_v15 = vrot.slane %v42_v10, %v46_v7  ;;  %v51_v16 = vrot.slane %v42_v10, %v50_v8 }
  0x19   :  { %p160_p11 = por %p159_p10, %p158_p9 }
  0x1b   :  { %p161_p12 = pnand %p160_p11, %p154_p8 }
  0x85   :  { %v67_v5 = vpop.permute.xlu1 %66  ;;  %v30_v6 = vpop.permute.xlu0 %29 }
  0x89   :  { %v69_v11 = vpop.permute.xlu1 %68  ;;  %v32_v12 = vpop.permute.xlu0 %31 }
  0x8a   :  { %v71_v17 = vsel %vm70_vm0, %v67_v5, %v69_v11  ;;  %v72_v18 = vsel %vm70_vm0, %v69_v11, %v67_v5  ;;  %v36_v19 = vsel %vm35_vm1, %v30_v6, %v32_v12  ;;  %v37_v20 = vsel %vm35_vm1, %v32_v12, %v30_v6 }
  0x8b   :  { %v73_v21 = vsub.f32 %v71_v17, %v27_v0  ;;  %v74_v22 = vsub.f32 %v72_v18, %v28_v1  ;;  %v38_v23 = vsub.f32 %v36_v19, %v27_v0  ;;  %v39_v24 = vsub.f32 %v37_v20, %v28_v1 }
  0x8d   :  { %v75_v25 = vmul.f32 %v73_v21, %v73_v21  ;;  %v76_v26 = vmul.f32 %v74_v22, %v74_v22  ;;  %v40_v27 = vmul.f32 %v38_v23, %v38_v23  ;;  %v41_v28 = vmul.f32 %v39_v24, %v39_v24 }
  0x8f   :  { %v89_v29 = vmul.f32 %v82_v13, %v75_v25  ;;  %v90_v30 = vmul.f32 %v86_v14, %v76_v26  ;;  %v54_v31 = vmul.f32 %v47_v15, %v40_v27  ;;  %v55_v32 = vmul.f32 %v51_v16, %v41_v28 }
  0x91   :  { %v91_v33 = vadd.f32 %v90_v30, %v89_v29  ;;  %v56_v34 = vadd.f32 %v55_v32, %v54_v31 }
  0x93   :  { %92 = vadd.xlane.f32.xlu1 %v91_v33  ;;  %57 = vadd.xlane.f32.xlu0 %v56_v34 }
 0x120   :  { %v93_v35 = vpop.xlane.xlu1 %92  ;;  %v58_v36 = vpop.xlane.xlu0 %57 }
 0x121   :  { %v94_v37 = vrot.slane %v93_v35, 4  ;;  %v59_v38 = vrot.slane %v58_v36, 4 }
 0x123   :  { %v95_v39 = vadd.f32 %v94_v37, %v93_v35  ;;  %v60_v40 = vadd.f32 %v59_v38, %v58_v36 }
 0x125   :  { %v96_v41 = vrot.slane %v95_v39, 2  ;;  %v61_v42 = vrot.slane %v60_v40, 2 }
 0x127   :  { %v97_v43 = vadd.f32 %v96_v41, %v95_v39  ;;  %v62_v44 = vadd.f32 %v61_v42, %v60_v40 }
 0x129   :  { %v63_v45 = vrot.slane %v62_v44, 1  ;;  %v98_v46 = vrot.slane %v97_v43, 1 }
 0x12b   :  { %v64_v47 = vadd.f32 %v63_v45, %v62_v44  ;;  %v99_v48 = vadd.f32 %v98_v46, %v97_v43 }
 0x12d   :  { %123 = vpush %v64_v47 }
 0x12e   :  { %125 = vpush %v99_v48 }
 0x15e   :  { %s124_s29 = spop %123 }
 0x15f   :  { %v105_v49 = vstv %s124_s29  ;;  %s126_s30 = spop %125 }
 0x160   :  { %v104_v50 = vstv %s126_s30 }
 0x161   :  { %v106_v51 = vsel %vm103_vm2, %v104_v50, %v105_v49 }
 0x162   :  { %107 = vst [vmem:[#allocation5] sm:$0xff] %v106_v51 }
 0x163   :  { %164 = shalt.err (!%p161_p12)
}
 0x164   :  { %s165_s7 = scalar_lea.hbm %s236_s3, 128 }
 0x165   :  { %p166_p13 = scmp.ne.s32.totalorder %s236_s3, %s165_s7  ;;  %p169_p0 = scmp.lt.u32.totalorder %s165_s7, %s236_s3 }
 0x167   :  { %p171_p1 = pnand %p169_p0, %p166_p13 }
 0x169   :  { %174 = shalt.err (!%p171_p1)
}
 0x16a   :  { %117 = dma.vmem_to_hbm [thread:$0]  %s115_s2, 128, %s236_s3, [#allocation4]  }
 0x16b   :  { %177 = dma.done.wait [#allocation4], 128  }
 0x16c   :  { %178 = vsyncadd [#allocation4], 4294967168 }
 0x16d   :  { %121 = vsyncpa [#allocation3], 1 }
 0x16e   :  { %122 = vsyncpa [#allocation4], 1 }

</bundles_post_ra>
